<compile_context>
chip_gen: v7x
topology: tpu7x:2x2x1
jax: 0.10.0
libtpu: 0.0.40
codegen_flags: <defaults>
</compile_context>

<pallas_src>
import math
import jax
import jax.numpy as jnp
from jax.experimental import pallas as pl
from jax.experimental.pallas import tpu as pltpu

HIDDEN = 32
NUM_HEADS = 4
HEAD_DIM = HIDDEN // NUM_HEADS
LN_EPS = 1e-12


def self_attention_kernel(x_ref, mask_ref, wqkv_ref, bqkv_ref, wd_ref, bd_ref,
                          gamma_ref, beta_ref, out_ref):
    """One grid step handles `Bblk` batch elements entirely in VMEM."""
    Bblk, S, H = x_ref.shape
    BH = Bblk * NUM_HEADS

    def over_batch(t):   # (NUM_HEADS, ...) -> (Bblk*NUM_HEADS, ...)
        return jnp.broadcast_to(t[None], (Bblk,) + t.shape).reshape((BH,) + t.shape[1:])

    # Hoist all small loads / broadcasts once (JAX does not CSE broadcast_in_dim).
    x = x_ref[...]                                                    # (Bblk, S, H)
    x_b = jnp.broadcast_to(x[:, None], (Bblk, NUM_HEADS, S, H)).reshape(BH, S, H)
    mask_b = jnp.broadcast_to(mask_ref[...][:, None],
                              (Bblk, NUM_HEADS, 1, S)).reshape(BH, 1, S)
    wqkv = over_batch(wqkv_ref[...])                                  # (BH, H, 3*HEAD_DIM)
    bqkv = over_batch(bqkv_ref[...])                                  # (BH, 1, 3*HEAD_DIM)
    wd = over_batch(wd_ref[...])                                      # (BH, HEAD_DIM, H)
    bd = bd_ref[...]                                                  # (1, H)
    gamma = gamma_ref[...]                                            # (1, H)
    beta = beta_ref[...]                                              # (1, H)

    # Heads-batched fused Q/K/V projection (1/sqrt(head_dim) pre-folded into Q).
    qkv = jnp.einsum("nsh,nhd->nsd", x_b, wqkv,
                     preferred_element_type=jnp.float32) + bqkv       # (BH, S, 3*HD)
    q = qkv[:, :, :HEAD_DIM]
    k = qkv[:, :, HEAD_DIM:2 * HEAD_DIM]
    v = qkv[:, :, 2 * HEAD_DIM:]

    # Heads-batched attention (flash-style einsums), softmax along keys.
    scores = jnp.einsum("nqd,nkd->nqk", q, k,
                        preferred_element_type=jnp.float32) + mask_b  # (BH, S, S)
    m = jnp.max(scores, axis=-1, keepdims=True)
    e = jnp.exp(scores - m)
    probs = e * pl.reciprocal(jnp.sum(e, axis=-1, keepdims=True), approx=True)
    # TODO(synk): attention dropout omitted (eval/inference semantics).
    ctx = jnp.einsum("nqk,nkd->nqd", probs, v,
                     preferred_element_type=jnp.float32)              # (BH, S, HD)

    # Output dense with the head-concat folded in: contract each head's context
    # against its (HEAD_DIM, H) slice of W_dense, then sum partials over heads.
    partial = jnp.einsum("nqd,ndh->nqh", ctx, wd,
                         preferred_element_type=jnp.float32)          # (BH, S, H)
    partial = partial.reshape(Bblk, NUM_HEADS, S, H)
    hidden = partial[:, 0]
    for h in range(1, NUM_HEADS):                                     # leading-dim slices only
        hidden = hidden + partial[:, h]
    hidden = hidden + bd
    # TODO(synk): output dropout omitted (eval/inference semantics).

    res = hidden + x                                                  # residual

    # LayerNorm (biased variance, eps inside sqrt) — matches the torch module.
    u = jnp.mean(res, axis=-1, keepdims=True)
    c = res - u
    s = jnp.mean(c * c, axis=-1, keepdims=True)
    out_ref[...] = (gamma * (c * jax.lax.rsqrt(s + LN_EPS)) + beta).astype(out_ref.dtype)


def _pack_params(params):
    """Host-side packing: per-head fused QKV weight/bias (Q pre-scaled) + dense."""
    wq, bq, wk, bk, wv, bv, wd, bd, gamma, beta = [jnp.asarray(p, jnp.float32) for p in params]
    H = HIDDEN
    scale = 1.0 / math.sqrt(HEAD_DIM)

    def head_cols(w):   # (H, H) -> (NUM_HEADS, H, HEAD_DIM)
        return w.reshape(H, NUM_HEADS, HEAD_DIM).transpose(1, 0, 2)

    def head_bias(b):   # (H,) -> (NUM_HEADS, 1, HEAD_DIM)
        return b.reshape(NUM_HEADS, 1, HEAD_DIM)

    wqkv = jnp.concatenate([head_cols(wq * scale), head_cols(wk), head_cols(wv)], axis=-1)
    bqkv = jnp.concatenate([head_bias(bq * scale), head_bias(bk), head_bias(bv)], axis=-1)
    wd3 = wd.reshape(NUM_HEADS, HEAD_DIM, H)
    row = lambda a: a.reshape(1, H)
    return wqkv, bqkv, wd3, row(bd), row(gamma), row(beta)


def self_attention(x, attention_mask, params, *, batch_block=None):
    """x: (B, S, H) f32; attention_mask: (B, 1, 1, S) additive f32 mask."""
    B, S, H = x.shape
    assert H == HIDDEN and H % NUM_HEADS == 0
    if batch_block is None:
        # At most two grid steps: lets the two v7x TensorCores split the batch
        # while amortizing per-step overhead on single-TC v5e / v6e.
        batch_block = max(1, B // 2)
    while B % batch_block:
        batch_block -= 1

    x = x.astype(jnp.float32)
    mask3 = attention_mask.reshape(B, 1, S).astype(jnp.float32)
    wqkv, bqkv, wd3, bd2, gamma2, beta2 = _pack_params(params)

    full = lambda shape: pl.BlockSpec(shape, lambda b: (0,) * len(shape))
    blk = lambda shape: pl.BlockSpec(shape, lambda b: (b,) + (0,) * (len(shape) - 1))

    return pl.pallas_call(
        self_attention_kernel,
        out_shape=jax.ShapeDtypeStruct((B, S, H), jnp.float32),
        grid=(B // batch_block,),
        in_specs=[
            blk((batch_block, S, H)),                       # x
            blk((batch_block, 1, S)),                       # additive mask
            full((NUM_HEADS, H, 3 * HEAD_DIM)),             # fused per-head QKV weight
            full((NUM_HEADS, 1, 3 * HEAD_DIM)),             # fused per-head QKV bias
            full((NUM_HEADS, HEAD_DIM, H)),                 # dense weight, head-split rows
            full((1, H)), full((1, H)), full((1, H)),       # dense bias, gamma, beta
        ],
        out_specs=blk((batch_block, S, H)),
        compiler_params=pltpu.CompilerParams(dimension_semantics=("parallel",)),
    )(x, mask3, wqkv, bqkv, wd3, bd2, gamma2, beta2)


def reference_self_attention(x, attention_mask, params):
    """Pure-JAX reference mirroring the PyTorch forward (dropout in eval mode)."""
    wq, bq, wk, bk, wv, bv, wd, bd, gamma, beta = params
    B, S, H = x.shape

    def split_heads(t):  # (B, S, H) -> (B, nh, S, hd)
        return t.reshape(B, S, NUM_HEADS, HEAD_DIM).transpose(0, 2, 1, 3)

    q = split_heads(x @ wq + bq)
    k = split_heads(x @ wk + bk)
    v = split_heads(x @ wv + bv)
    scores = jnp.einsum("bhqd,bhkd->bhqk", q, k) / math.sqrt(HEAD_DIM)
    scores = scores + attention_mask
    probs = jax.nn.softmax(scores, axis=-1)
    ctx = jnp.einsum("bhqk,bhkd->bhqd", probs, v).transpose(0, 2, 1, 3).reshape(B, S, H)
    hidden = ctx @ wd + bd
    res = hidden + x
    u = res.mean(-1, keepdims=True)
    s = ((res - u) ** 2).mean(-1, keepdims=True)
    return gamma * ((res - u) / jnp.sqrt(s + LN_EPS)) + beta


def init_params(key, hidden):
    ks = jax.random.split(key, 5)
    scale = 0.05
    wq = scale * jax.random.normal(ks[0], (hidden, hidden), jnp.float32)
    wk = scale * jax.random.normal(ks[1], (hidden, hidden), jnp.float32)
    wv = scale * jax.random.normal(ks[2], (hidden, hidden), jnp.float32)
    wd = scale * jax.random.normal(ks[3], (hidden, hidden), jnp.float32)
    bq = 0.01 * jax.random.normal(ks[4], (hidden,), jnp.float32)
    bk = jnp.zeros((hidden,), jnp.float32)
    bv = 0.02 * jnp.ones((hidden,), jnp.float32)
    bd = jnp.zeros((hidden,), jnp.float32)
    gamma = jnp.ones((hidden,), jnp.float32)
    beta = jnp.zeros((hidden,), jnp.float32)
    return (wq, bq, wk, bk, wv, bv, wd, bd, gamma, beta)


if __name__ == "__main__":
    B, S, H = 2, 8, HIDDEN
    key = jax.random.PRNGKey(0)
    kx, km, kp = jax.random.split(key, 3)

    x = jax.random.normal(kx, (B, S, H), jnp.float32)
    # BERT-style additive mask: 0 for visible, -10000 for masked keys.
    keep = (jax.random.uniform(km, (B, 1, 1, S)) > 0.25).astype(jnp.float32)
    attention_mask = (1.0 - keep) * -10000.0

    params = init_params(kp, H)
    ref = reference_self_attention(x, attention_mask, params)

    # Default: at most two grid steps (good split for v7x's two TensorCores).
    out = jax.block_until_ready(self_attention(x, attention_mask, params))
    assert out.shape == (B, S, H)
    # Tolerance loosened slightly for the approximate EUP reciprocal path.
    assert jnp.allclose(out, ref, atol=2e-3, rtol=2e-3), "mismatch vs reference"

    # Fully collapsed grid (all batches in one step) — the v5e/v6e-friendly setting.
    out2 = jax.block_until_ready(self_attention(x, attention_mask, params, batch_block=B))
    assert jnp.allclose(out2, ref, atol=2e-3, rtol=2e-3), "mismatch vs reference (batched block)"

    print("KERNEL_OK")
</pallas_src>

<mosaic_0001>
module attributes {stable_mosaic.version = 11 : i64} {
  func.func @self_attention_kernel(%arg0: i32, %arg1: memref<1x8x32xf32, #tpu.memory_space<vmem>>, %arg2: memref<1x1x8xf32, #tpu.memory_space<vmem>>, %arg3: memref<4x32x24xf32, #tpu.memory_space<vmem>>, %arg4: memref<4x1x24xf32, #tpu.memory_space<vmem>>, %arg5: memref<4x8x32xf32, #tpu.memory_space<vmem>>, %arg6: memref<1x32xf32, #tpu.memory_space<vmem>>, %arg7: memref<1x32xf32, #tpu.memory_space<vmem>>, %arg8: memref<1x32xf32, #tpu.memory_space<vmem>>, %arg9: memref<1x8x32xf32, #tpu.memory_space<vmem>>) attributes {dimension_semantics = [#tpu.dimension_semantics<parallel>], iteration_bounds = array<i64: 2>, scalar_prefetch = 0 : i64, scratch_operands = 0 : i64, tpu.core_type = #tpu.core_type<tc>, window_params = [{transform_indices = @transform_0, window_bounds = array<i64: 1, 8, 32>}, {transform_indices = @transform_1, window_bounds = array<i64: 1, 1, 8>}, {pipeline_mode = #tpu.pipeline_mode<synchronous>, transform_indices = @transform_2, window_bounds = array<i64: 4, 32, 24>}, {pipeline_mode = #tpu.pipeline_mode<synchronous>, transform_indices = @transform_3, window_bounds = array<i64: 4, 1, 24>}, {pipeline_mode = #tpu.pipeline_mode<synchronous>, transform_indices = @transform_4, window_bounds = array<i64: 4, 8, 32>}, {pipeline_mode = #tpu.pipeline_mode<synchronous>, transform_indices = @transform_5, window_bounds = array<i64: 1, 32>}, {pipeline_mode = #tpu.pipeline_mode<synchronous>, transform_indices = @transform_6, window_bounds = array<i64: 1, 32>}, {pipeline_mode = #tpu.pipeline_mode<synchronous>, transform_indices = @transform_7, window_bounds = array<i64: 1, 32>}, {transform_indices = @transform_8, window_bounds = array<i64: 1, 8, 32>}]} {
    %c0 = arith.constant 0 : index
    %c0_0 = arith.constant 0 : index
    %c0_1 = arith.constant 0 : index
    %0 = vector.load %arg1[%c0, %c0_0, %c0_1] : memref<1x8x32xf32, #tpu.memory_space<vmem>>, vector<1x8x32xf32>
    %1 = vector.shape_cast %0 : vector<1x8x32xf32> to vector<1x1x8x32xf32>
    %2 = vector.shape_cast %1 : vector<1x1x8x32xf32> to vector<1x1x8x32xf32>
    %3 = vector.broadcast %2 : vector<1x1x8x32xf32> to vector<1x4x8x32xf32>
    %4 = vector.shape_cast %3 : vector<1x4x8x32xf32> to vector<4x8x32xf32>
    %c0_2 = arith.constant 0 : index
    %c0_3 = arith.constant 0 : index
    %c0_4 = arith.constant 0 : index
    %5 = vector.load %arg2[%c0_2, %c0_3, %c0_4] : memref<1x1x8xf32, #tpu.memory_space<vmem>>, vector<1x1x8xf32>
    %6 = vector.shape_cast %5 : vector<1x1x8xf32> to vector<1x1x1x8xf32>
    %7 = vector.shape_cast %6 : vector<1x1x1x8xf32> to vector<1x1x1x8xf32>
    %8 = vector.broadcast %7 : vector<1x1x1x8xf32> to vector<1x4x1x8xf32>
    %9 = vector.shape_cast %8 : vector<1x4x1x8xf32> to vector<4x1x8xf32>
    %c0_5 = arith.constant 0 : index
    %c0_6 = arith.constant 0 : index
    %c0_7 = arith.constant 0 : index
    %10 = vector.load %arg3[%c0_5, %c0_6, %c0_7] : memref<4x32x24xf32, #tpu.memory_space<vmem>>, vector<4x32x24xf32>
    %11 = vector.shape_cast %10 : vector<4x32x24xf32> to vector<1x4x32x24xf32>
    %12 = vector.shape_cast %11 : vector<1x4x32x24xf32> to vector<4x32x24xf32>
    %c0_8 = arith.constant 0 : index
    %c0_9 = arith.constant 0 : index
    %c0_10 = arith.constant 0 : index
    %13 = vector.load %arg4[%c0_8, %c0_9, %c0_10] : memref<4x1x24xf32, #tpu.memory_space<vmem>>, vector<4x1x24xf32>
    %14 = vector.shape_cast %13 : vector<4x1x24xf32> to vector<1x4x1x24xf32>
    %15 = vector.shape_cast %14 : vector<1x4x1x24xf32> to vector<4x1x24xf32>
    %c0_11 = arith.constant 0 : index
    %c0_12 = arith.constant 0 : index
    %c0_13 = arith.constant 0 : index
    %16 = vector.load %arg5[%c0_11, %c0_12, %c0_13] : memref<4x8x32xf32, #tpu.memory_space<vmem>>, vector<4x8x32xf32>
    %17 = vector.shape_cast %16 : vector<4x8x32xf32> to vector<1x4x8x32xf32>
    %18 = vector.shape_cast %17 : vector<1x4x8x32xf32> to vector<4x8x32xf32>
    %c0_14 = arith.constant 0 : index
    %c0_15 = arith.constant 0 : index
    %19 = vector.load %arg6[%c0_14, %c0_15] : memref<1x32xf32, #tpu.memory_space<vmem>>, vector<1x32xf32>
    %c0_16 = arith.constant 0 : index
    %c0_17 = arith.constant 0 : index
    %20 = vector.load %arg7[%c0_16, %c0_17] : memref<1x32xf32, #tpu.memory_space<vmem>>, vector<1x32xf32>
    %c0_18 = arith.constant 0 : index
    %c0_19 = arith.constant 0 : index
    %21 = vector.load %arg8[%c0_18, %c0_19] : memref<1x32xf32, #tpu.memory_space<vmem>>, vector<1x32xf32>
    "tpu.trace_start"() <{level = 10 : i32, message = "nsh,nhd->nsd"}> : () -> ()
    %cst = arith.constant dense<0.000000e+00> : vector<4x8x24xf32>
    %22 = tpu.matmul %4, %12, %cst {dimension_numbers = #tpu.dot_dimension_numbers<[2], [1], [1], [2], [0, 0, 0, 1, 1, 2], [0], [0]>} : vector<4x8x32xf32>, vector<4x32x24xf32>, vector<4x8x24xf32> -> vector<4x8x24xf32>
    "tpu.trace_stop"() : () -> ()
    %23 = vector.broadcast %15 : vector<4x1x24xf32> to vector<4x8x24xf32>
    %24 = arith.addf %22, %23 : vector<4x8x24xf32>
    %25 = vector.extract_strided_slice %24 {offsets = [0, 0, 0], sizes = [4, 8, 8], strides = [1, 1, 1]} : vector<4x8x24xf32> to vector<4x8x8xf32>
    %26 = vector.extract_strided_slice %24 {offsets = [0, 0, 8], sizes = [4, 8, 8], strides = [1, 1, 1]} : vector<4x8x24xf32> to vector<4x8x8xf32>
    %27 = vector.extract_strided_slice %24 {offsets = [0, 0, 16], sizes = [4, 8, 8], strides = [1, 1, 1]} : vector<4x8x24xf32> to vector<4x8x8xf32>
    "tpu.trace_start"() <{level = 10 : i32, message = "nqd,nkd->nqk"}> : () -> ()
    %cst_20 = arith.constant dense<0.000000e+00> : vector<4x8x8xf32>
    %28 = tpu.matmul %25, %26, %cst_20 {dimension_numbers = #tpu.dot_dimension_numbers<[2], [2], [1], [1], [0, 0, 0, 1, 1, 1], [0], [0]>} : vector<4x8x8xf32>, vector<4x8x8xf32>, vector<4x8x8xf32> -> vector<4x8x8xf32>
    "tpu.trace_stop"() : () -> ()
    %29 = vector.broadcast %9 : vector<4x1x8xf32> to vector<4x8x8xf32>
    %30 = arith.addf %28, %29 : vector<4x8x8xf32>
    %cst_21 = arith.constant dense<0xFF800000> : vector<4x8xf32>
    %31 = vector.multi_reduction <maximumf>, %30, %cst_21 [2] : vector<4x8x8xf32> to vector<4x8xf32>
    %32 = vector.shape_cast %31 : vector<4x8xf32> to vector<4x8x1xf32>
    %33 = vector.broadcast %32 : vector<4x8x1xf32> to vector<4x8x8xf32>
    %34 = arith.subf %30, %33 : vector<4x8x8xf32>
    %35 = math.exp %34 : vector<4x8x8xf32>
    %cst_22 = arith.constant dense<0.000000e+00> : vector<4x8xf32>
    %36 = vector.multi_reduction <add>, %35, %cst_22 [2] : vector<4x8x8xf32> to vector<4x8xf32>
    %37 = vector.shape_cast %36 : vector<4x8xf32> to vector<4x8x1xf32>
    %38 = tpu.reciprocal %37 {approx = true} : vector<4x8x1xf32> -> vector<4x8x1xf32>
    %39 = vector.broadcast %38 : vector<4x8x1xf32> to vector<4x8x8xf32>
    %40 = arith.mulf %35, %39 : vector<4x8x8xf32>
    "tpu.trace_start"() <{level = 10 : i32, message = "nqk,nkd->nqd"}> : () -> ()
    %cst_23 = arith.constant dense<0.000000e+00> : vector<4x8x8xf32>
    %41 = tpu.matmul %40, %27, %cst_23 {dimension_numbers = #tpu.dot_dimension_numbers<[2], [1], [1], [2], [0, 0, 0, 1, 1, 2], [0], [0]>} : vector<4x8x8xf32>, vector<4x8x8xf32>, vector<4x8x8xf32> -> vector<4x8x8xf32>
    "tpu.trace_stop"() : () -> ()
    "tpu.trace_start"() <{level = 10 : i32, message = "nqd,ndh->nqh"}> : () -> ()
    %cst_24 = arith.constant dense<0.000000e+00> : vector<4x8x32xf32>
    %42 = tpu.matmul %41, %18, %cst_24 {dimension_numbers = #tpu.dot_dimension_numbers<[2], [1], [1], [2], [0, 0, 0, 1, 1, 2], [0], [0]>} : vector<4x8x8xf32>, vector<4x8x32xf32>, vector<4x8x32xf32> -> vector<4x8x32xf32>
    "tpu.trace_stop"() : () -> ()
    %43 = vector.shape_cast %42 : vector<4x8x32xf32> to vector<1x4x8x32xf32>
    %44 = vector.extract_strided_slice %43 {offsets = [0, 0, 0, 0], sizes = [1, 1, 8, 32], strides = [1, 1, 1, 1]} : vector<1x4x8x32xf32> to vector<1x1x8x32xf32>
    %45 = vector.shape_cast %44 : vector<1x1x8x32xf32> to vector<1x8x32xf32>
    %46 = vector.extract_strided_slice %43 {offsets = [0, 1, 0, 0], sizes = [1, 1, 8, 32], strides = [1, 1, 1, 1]} : vector<1x4x8x32xf32> to vector<1x1x8x32xf32>
    %47 = vector.shape_cast %46 : vector<1x1x8x32xf32> to vector<1x8x32xf32>
    %48 = arith.addf %45, %47 : vector<1x8x32xf32>
    %49 = vector.extract_strided_slice %43 {offsets = [0, 2, 0, 0], sizes = [1, 1, 8, 32], strides = [1, 1, 1, 1]} : vector<1x4x8x32xf32> to vector<1x1x8x32xf32>
    %50 = vector.shape_cast %49 : vector<1x1x8x32xf32> to vector<1x8x32xf32>
    %51 = arith.addf %48, %50 : vector<1x8x32xf32>
    %52 = vector.extract_strided_slice %43 {offsets = [0, 3, 0, 0], sizes = [1, 1, 8, 32], strides = [1, 1, 1, 1]} : vector<1x4x8x32xf32> to vector<1x1x8x32xf32>
    %53 = vector.shape_cast %52 : vector<1x1x8x32xf32> to vector<1x8x32xf32>
    %54 = arith.addf %51, %53 : vector<1x8x32xf32>
    %55 = vector.shape_cast %19 : vector<1x32xf32> to vector<1x1x32xf32>
    %56 = vector.broadcast %55 : vector<1x1x32xf32> to vector<1x8x32xf32>
    %57 = arith.addf %54, %56 : vector<1x8x32xf32>
    %58 = arith.addf %57, %0 : vector<1x8x32xf32>
    %cst_25 = arith.constant dense<0.000000e+00> : vector<1x8xf32>
    %59 = vector.multi_reduction <add>, %58, %cst_25 [2] : vector<1x8x32xf32> to vector<1x8xf32>
    %60 = vector.shape_cast %59 : vector<1x8xf32> to vector<1x8x1xf32>
    %cst_26 = arith.constant 3.200000e+01 : f32
    %61 = vector.broadcast %cst_26 : f32 to vector<1x8x1xf32>
    %62 = arith.divf %60, %61 : vector<1x8x1xf32>
    %63 = vector.broadcast %62 : vector<1x8x1xf32> to vector<1x8x32xf32>
    %64 = arith.subf %58, %63 : vector<1x8x32xf32>
    %65 = arith.mulf %64, %64 : vector<1x8x32xf32>
    %cst_27 = arith.constant dense<0.000000e+00> : vector<1x8xf32>
    %66 = vector.multi_reduction <add>, %65, %cst_27 [2] : vector<1x8x32xf32> to vector<1x8xf32>
    %67 = vector.shape_cast %66 : vector<1x8xf32> to vector<1x8x1xf32>
    %cst_28 = arith.constant 3.200000e+01 : f32
    %68 = vector.broadcast %cst_28 : f32 to vector<1x8x1xf32>
    %69 = arith.divf %67, %68 : vector<1x8x1xf32>
    %cst_29 = arith.constant 9.99999996E-13 : f32
    %70 = vector.broadcast %cst_29 : f32 to vector<1x8x1xf32>
    %71 = arith.addf %69, %70 : vector<1x8x1xf32>
    %72 = math.rsqrt %71 : vector<1x8x1xf32>
    %73 = vector.broadcast %72 : vector<1x8x1xf32> to vector<1x8x32xf32>
    %74 = arith.mulf %64, %73 : vector<1x8x32xf32>
    %75 = vector.shape_cast %20 : vector<1x32xf32> to vector<1x1x32xf32>
    %76 = vector.broadcast %75 : vector<1x1x32xf32> to vector<1x8x32xf32>
    %77 = arith.mulf %76, %74 : vector<1x8x32xf32>
    %78 = vector.shape_cast %21 : vector<1x32xf32> to vector<1x1x32xf32>
    %79 = vector.broadcast %78 : vector<1x1x32xf32> to vector<1x8x32xf32>
    %80 = arith.addf %77, %79 : vector<1x8x32xf32>
    %c0_30 = arith.constant 0 : index
    %c0_31 = arith.constant 0 : index
    %c0_32 = arith.constant 0 : index
    %81 = vector.load %arg9[%c0_30, %c0_31, %c0_32] : memref<1x8x32xf32, #tpu.memory_space<vmem>>, vector<1x8x32xf32>
    tpu.vector_store %arg9[%c0_30, %c0_31, %c0_32], %80 {strides = array<i32>} : memref<1x8x32xf32, #tpu.memory_space<vmem>>, vector<1x8x32xf32>,
    return
  }
  func.func @transform_0(%arg0: i32) -> (i32, i32, i32) {
    %c0_i32 = arith.constant 0 : i32
    %c0_i32_0 = arith.constant 0 : i32
    %c0_i32_1 = arith.constant 0 : i32
    return %arg0, %c0_i32, %c0_i32_0 : i32, i32, i32
  }
  func.func @transform_1(%arg0: i32) -> (i32, i32, i32) {
    %c0_i32 = arith.constant 0 : i32
    %c0_i32_0 = arith.constant 0 : i32
    %c0_i32_1 = arith.constant 0 : i32
    return %arg0, %c0_i32, %c0_i32_0 : i32, i32, i32
  }
  func.func @transform_2(%arg0: i32) -> (i32, i32, i32) {
    %c0_i32 = arith.constant 0 : i32
    %c0_i32_0 = arith.constant 0 : i32
    %c0_i32_1 = arith.constant 0 : i32
    %c0_i32_2 = arith.constant 0 : i32
    return %c0_i32, %c0_i32_0, %c0_i32_1 : i32, i32, i32
  }
  func.func @transform_3(%arg0: i32) -> (i32, i32, i32) {
    %c0_i32 = arith.constant 0 : i32
    %c0_i32_0 = arith.constant 0 : i32
    %c0_i32_1 = arith.constant 0 : i32
    %c0_i32_2 = arith.constant 0 : i32
    return %c0_i32, %c0_i32_0, %c0_i32_1 : i32, i32, i32
  }
  func.func @transform_4(%arg0: i32) -> (i32, i32, i32) {
    %c0_i32 = arith.constant 0 : i32
    %c0_i32_0 = arith.constant 0 : i32
    %c0_i32_1 = arith.constant 0 : i32
    %c0_i32_2 = arith.constant 0 : i32
    return %c0_i32, %c0_i32_0, %c0_i32_1 : i32, i32, i32
  }
  func.func @transform_5(%arg0: i32) -> (i32, i32) {
    %c0_i32 = arith.constant 0 : i32
    %c0_i32_0 = arith.constant 0 : i32
    %c0_i32_1 = arith.constant 0 : i32
    return %c0_i32, %c0_i32_0 : i32, i32
  }
  func.func @transform_6(%arg0: i32) -> (i32, i32) {
    %c0_i32 = arith.constant 0 : i32
    %c0_i32_0 = arith.constant 0 : i32
    %c0_i32_1 = arith.constant 0 : i32
    return %c0_i32, %c0_i32_0 : i32, i32
  }
  func.func @transform_7(%arg0: i32) -> (i32, i32) {
    %c0_i32 = arith.constant 0 : i32
    %c0_i32_0 = arith.constant 0 : i32
    %c0_i32_1 = arith.constant 0 : i32
    return %c0_i32, %c0_i32_0 : i32, i32
  }
  func.func @transform_8(%arg0: i32) -> (i32, i32, i32) {
    %c0_i32 = arith.constant 0 : i32
    %c0_i32_0 = arith.constant 0 : i32
    %c0_i32_1 = arith.constant 0 : i32
    return %arg0, %c0_i32, %c0_i32_0 : i32, i32, i32
  }
}

</mosaic_0001>

<bundles_post_ra>
// kernel: tpu_custom_call.1
= control target key start
LH: loop header
LB: loop body
LE: loop exit
PB: predicated region body
PF: predicated region fallthrough
CT: control target
= control target key end

     0   :  { %13 = vsyncpa [#allocation3], 0  ;;  %s2405_s0 = inlined_call_operand.vmem [shape: f32[2,8,32], index: 0, kind: input, shape index: {}]   ;;  %s2406_s1 = inlined_call_operand.vmem [shape: f32[2,1,8], index: 1, kind: input, shape index: {}]   ;;  %s2407_s2 = inlined_call_operand.vmem [shape: f32[4,32,24], index: 2, kind: input, shape index: {}]   ;;  %s2408_s3 = inlined_call_operand.vmem [shape: f32[4,1,24], index: 3, kind: input, shape index: {}]   ;;  %s2409_s4 = inlined_call_operand.vmem [shape: f32[4,8,32], index: 4, kind: input, shape index: {}]   ;;  %s2410_s5 = inlined_call_operand.vmem [shape: f32[1,32], index: 5, kind: input, shape index: {}]   ;;  %s2411_s6 = inlined_call_operand.vmem [shape: f32[1,32], index: 6, kind: input, shape index: {}]   ;;  %s2412_s7 = inlined_call_operand.vmem [shape: f32[1,32], index: 7, kind: input, shape index: {}]   ;;  %s2413_s8 = inlined_call_operand.hbm [shape: f32[2,8,32], index: 8, kind: output, shape index: {}]  }
   0x1   :  { %15 = vsyncpa [#allocation3 + $0x1], 0  ;;  %s2116_s27 = smov 0   ;;  %s2118_s28 = smov 0  }
   0x2   :  { %s2120_s29 = smov 0   ;;  %s2122_s30 = smov 0  }
   0x3 LB: > { %s2137_s9 = sadd.s32 4294967295, %s2063_s30   ;;  %s1729_s10 = sadd.s32 4294967294, %s2063_s30   ;;  %s2063_s30 = sphi %s2122_s30, %s2419_s30   ;;  %s2059_s29 = sphi %s2120_s29, %s2418_s29   ;;  %s2055_s28 = sphi %s2118_s28, %s2417_s28   ;;  %s2051_s27 = sphi %s2116_s27, %s2416_s27  }
   0x4   : > { %s2141_s11 = sadd.s32 1, %s2063_s30   ;;  %s206_s12 = sadd.s32 1, %s2059_s29 }
   0x5   : > { %s203_s13 = ssub.s32 %s2063_s30, %s2141_s11  ;;  %p216_p0 = scmp.ne.s32.totalorder %s2059_s29, %s2055_s28 }
   0x6   : > { %p204_p1 = scmp.eq.s32.totalorder %s203_s13, 0  ;;  %p217_p2 = scmp.eq.s32.totalorder %s2137_s9, 1 }
   0x7   : > { %p222_p3 = scmp.ne.s32.totalorder %s2055_s28, %s2051_s27  ;;  %p223_p4 = scmp.eq.s32.totalorder %s1729_s10, 1 }
   0x8   : > { %s2152_s14 = scalar_select %p204_p1, %s2059_s29, %s206_s12  }
   0x9   : > { %p2154_p5 = por %p217_p2, %p216_p0  ;;  %p2158_p6 = por %p223_p4, %p222_p3 }
   0xa   : > { %p1732_p7 = scmp.ge.s32.totalorder %s2063_s30, 1  ;;  %p272_p8 = scmp.lt.s32.totalorder %s2063_s30, 3 }
   0xc   : > { %p273_p9 = pnand %p1732_p7, %p272_p8 }
   0xd   : > { %v317_v0 = vld [vmem:[%s2407_s2] sm:$0xff] (!%p273_p9)  ;;  %v318_v1 = vld [vmem:[%s2407_s2 + $0x8] sm:$0xff] (!%p273_p9)  ;;  %v2065_v3 = vmov (!%p273_p9), 0.0|0.0   ;;  %v319_v6 = vld [vmem:[%s2407_s2 + $0x10] sm:$0xff] (!%p273_p9)  ;;  %p308_p10 = scmp.lt.s32.totalorder (!%p273_p9), %s2137_s9, 1  ;;  %vm2066_vm0 = vmmov (!%p273_p9), 0  }
   0xe   : > { %276 = sbr.rel (%p273_p9) target bundleno = 1655 (0x677), region = 52  ;;  %v321_v2 = vld [vmem:[%s2407_s2 + $0x20] sm:$0xff] (!%p273_p9)  ;;  %1915 = vmatprep.subr.bf16.mxu0 (!%p273_p9), %v2065_v3  ;;  %v1916_v4 = vpack.c.bf16 (!%p273_p9), %v318_v1, %v317_v0  ;;  %1921 = vmatprep.subr.bf16.mxu1 (!%p273_p9), %v2065_v3  ;;  %v322_v5 = vld [vmem:[%s2407_s2 + $0x28] sm:$0xff] (!%p273_p9)  ;;  %v320_v7 = vld [vmem:[%s2407_s2 + $0x18] sm:$0xff] (!%p273_p9)  ;;  %v2067_v9 = vmov (!%p273_p9), 0.0   ;;  %vm368_vm1 = vcmask (!%p273_p9), 261120  }
   0xf   : > { %v1922_v8 = vpack.c.bf16 (!%p273_p9), %v322_v5, %v321_v2  ;;  %1819 = vmatprep.mubr.msk.f32.mxu0 (!%p273_p9), %vm2066_vm0, %v2067_v9  ;;  %v323_v10 = vld [vmem:[%s2407_s2 + $0x30] sm:$0xff] (!%p273_p9)  ;;  %v324_v11 = vld [vmem:[%s2407_s2 + $0x38] sm:$0xff] (!%p273_p9)  ;;  %1830 = vmatprep.mubr.msk.f32.mxu1 (!%p273_p9), %vm2066_vm0, %v2067_v9  ;;  %v1919_v12 = vpack.c.bf16 (!%p273_p9), %v320_v7, %v319_v6  ;;  %v325_v14 = vld [vmem:[%s2407_s2 + $0x40] sm:$0xff] (!%p273_p9)  ;;  %s2068_s21 = smov (!%p273_p9), 120   ;;  %vm661_vm2 = vcmask (!%p273_p9), 64512  }
  0x10   : > { %1917 = vmatpush3.bf16.msra.mxu0 (!%p273_p9), %v1916_v4  ;;  %v1925_v13 = vpack.c.bf16 (!%p273_p9), %v324_v11, %v323_v10  ;;  %v326_v15 = vld [vmem:[%s2407_s2 + $0x48] sm:$0xff] (!%p273_p9)  ;;  %v329_v16 = vld [vmem:[%s2407_s2 + $0x60] sm:$0xff] (!%p273_p9)  ;;  %v327_v21 = vld [vmem:[%s2407_s2 + $0x50] sm:$0xff] (!%p273_p9) }
  0x11   : > { %1918 = vmatprep.subr.bf16.mxu0 (!%p273_p9), %v2065_v3  ;;  %1923 = vmatpush3.bf16.msra.mxu1 (!%p273_p9), %v1922_v8  ;;  %v330_v17 = vld [vmem:[%s2407_s2 + $0x68] sm:$0xff] (!%p273_p9)  ;;  %v1928_v19 = vpack.c.bf16 (!%p273_p9), %v326_v15, %v325_v14  ;;  %v328_v22 = vld [vmem:[%s2407_s2 + $0x58] sm:$0xff] (!%p273_p9)  ;;  %v331_v23 = vld [vmem:[%s2407_s2 + $0x70] sm:$0xff] (!%p273_p9) }
  0x12   : > { %1924 = vmatprep.subr.bf16.mxu1 (!%p273_p9), %v2065_v3  ;;  %v1934_v20 = vpack.c.bf16 (!%p273_p9), %v330_v17, %v329_v16  ;;  %v332_v24 = vld [vmem:[%s2407_s2 + $0x78] sm:$0xff] (!%p273_p9)  ;;  %v1931_v25 = vpack.c.bf16 (!%p273_p9), %v328_v22, %v327_v21  ;;  %v1735_v27 = vld [vmem:[%s2408_s3] ss:$0 sm:$0xff] (!%p273_p9)  ;;  %v1736_v29 = vld [vmem:[%s2408_s3 + $0x1] ss:$0 sm:$0xff] (!%p273_p9) }
  0x13   : > { %v1937_v26 = vpack.c.bf16 (!%p273_p9), %v332_v24, %v331_v23  ;;  %v1737_v35 = vld [vmem:[%s2408_s3 + $0x2] ss:$0 sm:$0xff] (!%p273_p9)  ;;  %v1738_v37 = vld [vmem:[%s2408_s3 + $0x3] ss:$0 sm:$0xff] (!%p273_p9) }
  0x14   : > { %1920 = vmatpush3.bf16.msra.mxu0 (!%p273_p9), %v1919_v12 }
  0x15   : > { %s2194_s20 = scalar_select %p308_p10, %s2137_s9, 1  ;;  %1926 = vmatpush3.bf16.msra.mxu1 %v1925_v13  ;;  %1927 = vmatprep.subr.bf16.mxu0 %v2065_v3 }
  0x16   : > { %1933 = vmatprep.subr.bf16.mxu1 %v2065_v3 }
  0x17   : > { %s1734_s25 = sshll.u32 %s2194_s20, 3  ;;  %s314_s12 = scalar_lea.vmem %s2406_s1, %s2194_s20 }
  0x18   : > { %s311_s19 = scalar_lea.vmem %s2405_s0, %s1734_s25  ;;  %v1743_v47 = vld [vmem:[%s314_s12] ss:$0 sm:$0xff]  ;;  %s2069_s20 = smov 112  }
  0x19   : > { %v2212_v18 = vld [vmem:[%s311_s19] sm:$0xff]  ;;  %s305_s25 = sand.u32 1, %s2055_s28   ;;  %s1764_s19 = sshll.u32 %s2137_s9, 7 }
  0x1a   : > { %1820 = vmatmul.mubr.msk.f32.vlgmr.msra.gmra.mrb[0].mxu0 %vm368_vm1, %v2212_v18  ;;  %1831 = vmatmul.mubr.msk.f32.vlgmr.msra.gmra.mrb[0].mxu1 %vm368_vm1, %v2212_v18  ;;  %s1733_s12 = sshll.u32 %s305_s25, 3  ;;  %s2362_s26 = scalar_lea.hbm %s2413_s8, %s1764_s19 }
  0x1b   : > { %1929 = vmatpush3.bf16.msra.mxu0 %v1928_v19  ;;  %1935 = vmatpush3.bf16.msra.mxu1 %v1934_v20  ;;  %s1648_s10 = scalar_lea.sflag [#allocation3], %s305_s25  ;;  %s2070_s9 = smov [#allocation2]  }
  0x1c   : > { %1930 = vmatprep.subr.bf16.mxu0 %v2065_v3  ;;  %1841 = vmatprep.mubr.msk.f32.mxu0 %vm2066_vm0, %v2067_v9 }
  0x1d   : > { %1936 = vmatprep.subr.bf16.mxu1 %v2065_v3  ;;  %1852 = vmatprep.mubr.msk.f32.mxu1 %vm2066_vm0, %v2067_v9 }
  0x1f   : > { %1932 = vmatpush3.bf16.msra.mxu0 %v1931_v25  ;;  %1938 = vmatpush3.bf16.msra.mxu1 %v1937_v26 }
  0x20   : > { %1855 = vmatprep.subr.mxu0 %v2067_v9  ;;  %1860 = vmatprep.subr.mxu1 %v2067_v9 }
  0x22   : > { %1842 = vmatmul.mubr.msk.f32.vlgmr.msra.gmra.mrb[2].mxu0 %vm368_vm1, %v2212_v18  ;;  %1853 = vmatmul.mubr.msk.f32.vlgmr.msra.gmra.mrb[2].mxu1 %vm368_vm1, %v2212_v18 }
  0x23   : > { %1857 = vmatprep.mubr.msk.f32.mxu0 %vm2066_vm0, %v2067_v9  ;;  %1862 = vmatprep.mubr.msk.f32.mxu1 %vm2066_vm0, %v2067_v9 }
  0xed   : > { %v438_v28 = vpop.f32.mrb[0].mxu0  ;;  %v508_v32 = vpop.f32.mrb[0].mxu1 }
  0xee   : > { %v439_v30 = vadd.f32 %v1735_v27, %v438_v28  ;;  %v1821_v31 = vpop.f32.mrb[1].mxu0  ;;  %v1832_v33 = vpop.f32.mrb[1].mxu1  ;;  %v2250_v34 = vadd.f32 %v1736_v29, %v508_v32 }
  0xf0   : > { %659 = vrot.lane.b32.xlu0 %v439_v30, %s2068_s21 }
  0xf4   : > { %737 = vrot.lane.b32.xlu0 %v2250_v34, %s2068_s21 }
  0xf5   : > { %v578_v36 = vpop.f32.mrb[2].mxu0  ;;  %v648_v40 = vpop.f32.mrb[2].mxu1 }
  0xf6   : > { %v2259_v38 = vadd.f32 %v1737_v35, %v578_v36  ;;  %v1843_v39 = vpop.f32.mrb[3].mxu0  ;;  %v1854_v41 = vpop.f32.mrb[3].mxu1  ;;  %v2261_v42 = vadd.f32 %v1738_v37, %v648_v40  ;;  %v339_v40 = vld [vmem:[%s2409_s4 + $0x10] sm:$0xff] }
  0xf7   : > { %v338_v39 = vld [vmem:[%s2409_s4 + $0x8] sm:$0xff] }
  0xf8   : > { %814 = vrot.lane.b32.xlu1 %v2259_v38, %s2068_s21 }
  0xfc   : > { %891 = vrot.lane.b32.xlu1 %v2261_v42, %s2068_s21  ;;  %s307_s21 = scalar_lea.vmem [#allocation2], %s1733_s12  ;;  %s2005_s12 = sshll.u32 %s2070_s9, 4  ;;  %s2006_s12 = int_to_ptr.vmem [resolvable:$false] %s2005_s12 }
  0xfd   : > { %s1661_s22 = sshll.u32 %s307_s21, 4  ;;  %s2007_s13 = scalar_lea.vmem %s2006_s12, 256  ;;  %s2364_s22 = int_to_ptr.vmem [resolvable:$true] %s1661_s22 }
  0xfe   : > { %p2008_p0 = scmp.lt.s32.totalorder %s2364_s22, %s2006_s12 }
 0x162   : > { %v660_v43 = vpop.permute.xlu0 %659 }
 0x163   : > { %1856 = vmatpush3.xpose.msk.msra.mxu0 %vm661_vm2, %v660_v43  ;;  %v340_v43 = vld [vmem:[%s2409_s4 + $0x18] sm:$0xff] }
 0x164   : > { %1865 = vmatprep.subr.mxu0 %v2067_v9 }
 0x166   : > { %1858 = vmatmul.mubr.msk.f32.vlgmr.msra.gmra.mrb[4].mxu0 %vm661_vm2, %v439_v30  ;;  %v738_v44 = vpop.permute.xlu0 %737 }
 0x167   : > { %1861 = vmatpush3.xpose.msk.msra.mxu1 %vm661_vm2, %v738_v44  ;;  %1867 = vmatprep.mubr.msk.f32.mxu0 %vm2066_vm0, %v2067_v9 }
 0x168   : > { %1870 = vmatprep.subr.mxu1 %v2067_v9 }
 0x16a   : > { %1863 = vmatmul.mubr.msk.f32.vlgmr.msra.gmra.mrb[4].mxu1 %vm661_vm2, %v2250_v34  ;;  %v815_v45 = vpop.permute.xlu1 %814 }
 0x16b   : > { %1866 = vmatpush3.xpose.msk.msra.mxu0 %vm661_vm2, %v815_v45  ;;  %1872 = vmatprep.mubr.msk.f32.mxu1 %vm2066_vm0, %v2067_v9 }
 0x16c   : > { %1875 = vmatprep.subr.mxu0 %v2067_v9 }
 0x16e   : > { %1868 = vmatmul.mubr.msk.f32.vlgmr.msra.gmra.mrb[6].mxu0 %vm661_vm2, %v2259_v38  ;;  %v892_v46 = vpop.permute.xlu1 %891 }
 0x16f   : > { %1871 = vmatpush3.xpose.msk.msra.mxu1 %vm661_vm2, %v892_v46  ;;  %1877 = vmatprep.mubr.msk.f32.mxu0 %vm2066_vm0, %v2067_v9 }
 0x170   : > { %1880 = vmatprep.subr.mxu1 %v2067_v9 }
 0x172   : > { %1873 = vmatmul.mubr.msk.f32.vlgmr.msra.gmra.mrb[6].mxu1 %vm661_vm2, %v2261_v42 }
 0x173   : > { %1882 = vmatprep.mubr.msk.f32.mxu1 %vm2066_vm0, %v2067_v9 }
 0x239   : > { %v732_v48 = vpop.f32.mrb[4].mxu0 }
 0x23a   : > { %v733_v49 = vadd.f32 %v1743_v47, %v732_v48  ;;  %v1859_v50 = vpop.f32.mrb[5].mxu0 }
 0x23c   : > { %v967_v51 = vsel %vm661_vm2, %v733_v49, -inf }
 0x23d   : > { %v809_v52 = vpop.f32.mrb[4].mxu1  ;;  %968 = vmax.xlane.f32.xlu0 %v967_v51 }
 0x23e   : > { %v810_v53 = vadd.f32 %v1743_v47, %v809_v52  ;;  %v1864_v54 = vpop.f32.mrb[5].mxu1 }
 0x240   : > { %v970_v55 = vsel %vm661_vm2, %v810_v53, -inf }
 0x241   : > { %971 = vmax.xlane.f32.xlu1 %v970_v55  ;;  %v886_v56 = vpop.f32.mrb[6].mxu0 }
 0x242   : > { %v887_v57 = vadd.f32 %v1743_v47, %v886_v56  ;;  %v1869_v58 = vpop.f32.mrb[7].mxu0 }
 0x244   : > { %v973_v59 = vsel %vm661_vm2, %v887_v57, -inf }
 0x245   : > { %v963_v60 = vpop.f32.mrb[6].mxu1  ;;  %974 = vmax.xlane.f32.xlu0 %v973_v59 }
 0x246   : > { %v964_v61 = vadd.f32 %v1743_v47, %v963_v60  ;;  %v1874_v62 = vpop.f32.mrb[7].mxu1 }
 0x248   : > { %v976_v63 = vsel %vm661_vm2, %v964_v61, -inf }
 0x249   : > { %977 = vmax.xlane.f32.xlu0 %v976_v63 }
 0x252   : > { %1011 = vrot.lane.b32.xlu1 %v439_v30, %s2069_s20 }
 0x2ca   : > { %v969_v0 = vpop.xlane.xlu0 %968 }
 0x2cb   : > { %v979_v1 = vsub.f32 %v733_v49, %v969_v0 }
 0x2cd   : > { %v983_v2 = vmul.f32 1.442695, %v979_v1 }
 0x2ce   : > { %v972_v3 = vpop.xlane.xlu1 %971 }
 0x2cf   : > { %1983 = vpow2.f32 %v983_v2  ;;  %v980_v4 = vsub.f32 %v810_v53, %v972_v3 }
 0x2d1   : > { %v985_v5 = vmul.f32 1.442695, %v980_v4 }
 0x2d2   : > { %v1012_v6 = vpop.permute.xlu1 %1011  ;;  %v975_v7 = vpop.xlane.xlu0 %974 }
 0x2d3   : > { %1985 = vpow2.f32 %v985_v5  ;;  %v981_v8 = vsub.f32 %v887_v57, %v975_v7  ;;  %1876 = vmatpush3.msra.mxu0 %v1012_v6 }
 0x2d4   : > { %1885 = vmatprep.subr.mxu0 %v2067_v9 }
 0x2d5   : > { %v987_v10 = vmul.f32 1.442695, %v981_v8 }
 0x2d6   : > { %v978_v11 = vpop.xlane.xlu0 %977 }
 0x2d7   : > { %1987 = vpow2.f32 %v987_v10  ;;  %v982_v12 = vsub.f32 %v964_v61, %v978_v11  ;;  %v1762_v11 = vld [vmem:[%s2412_s7] ss:$0 sm:$0xff] }
 0x2d9   : > { %v1984_v13 = vpop.eup %1983  ;;  %v989_v14 = vmul.f32 1.442695, %v982_v12 }
 0x2da   : > { %v991_v15 = vsel %vm661_vm2, %v1984_v13, 0.0 }
 0x2db   : > { %1989 = vpow2.f32 %v989_v14  ;;  %992 = vadd.xlane.f32.xlu1 %v991_v15 }
 0x2dd   : > { %v1986_v16 = vpop.eup %1985 }
 0x2de   : > { %v994_v17 = vsel %vm661_vm2, %v1986_v16, 0.0 }
 0x2df   : > { %995 = vadd.xlane.f32.xlu0 %v994_v17 }
 0x2e1   : > { %v1988_v19 = vpop.eup %1987 }
 0x2e2   : > { %v997_v20 = vsel %vm661_vm2, %v1988_v19, 0.0 }
 0x2e3   : > { %998 = vadd.xlane.f32.xlu1 %v997_v20 }
 0x2e5   : > { %v1990_v21 = vpop.eup %1989 }
 0x2e6   : > { %v1000_v22 = vsel %vm661_vm2, %v1990_v21, 0.0 }
 0x2e7   : > { %1001 = vadd.xlane.f32.xlu0 %v1000_v22 }
 0x2f4   : > { %1163 = vrot.lane.b32.xlu1 %v2259_v38, %s2069_s20  ;;  %v337_v38 = vld [vmem:[%s2409_s4] sm:$0xff] }
 0x2f8   : > { %1239 = vrot.lane.b32.xlu1 %v2261_v42, %s2069_s20 }
 0x2fd   : > { %1087 = vrot.lane.b32.xlu0 %v2250_v34, %s2069_s20  ;;  %s2001_s20 = scalar_lea.vmem %s2364_s22, 128 }
 0x2fe   : > { %p2002_p11 = scmp.ne.s32.totalorder %s2364_s22, %s2001_s20  ;;  %p2009_p1 = scmp.lt.s32.totalorder %s2007_s13, %s2001_s20 }
 0x300   : > { %p2003_p12 = pnand %p2002_p11, %p2154_p5  ;;  %p2010_p2 = por %p2009_p1, %p2008_p0 }
 0x302   : > { %p2004_p13 = pneg %p2003_p12 }
 0x304   : > { %p2011_p3 = pnand %p2010_p2, %p2004_p13 }
 0x368   : > { %v993_v23 = vpop.xlane.xlu1 %992 }
 0x369   : > { %1991 = vrcp.f32 %v993_v23 }
 0x36c   : > { %v996_v24 = vpop.xlane.xlu0 %995 }
 0x36d   : > { %1993 = vrcp.f32 %v996_v24 }
 0x370   : > { %v999_v25 = vpop.xlane.xlu1 %998 }
 0x371   : > { %1995 = vrcp.f32 %v999_v25 }
 0x373   : > { %v1992_v26 = vpop.eup %1991 }
 0x374   : > { %v1007_v27 = vmul.f32 %v1992_v26, %v1984_v13  ;;  %v1164_v28 = vpop.permute.xlu1 %1163  ;;  %v1002_v29 = vpop.xlane.xlu0 %1001 }
 0x375   : > { %1997 = vrcp.f32 %v1002_v29 }
 0x376   : > { %1878 = vmatmul.mubr.msk.f32.vlgmr.msra.gmra.mrb[8].mxu0 %vm661_vm2, %v1007_v27 }
 0x377   : > { %v1994_v30 = vpop.eup %1993  ;;  %1886 = vmatpush3.msra.mxu0 %v1164_v28  ;;  %1887 = vmatprep.mubr.msk.f32.mxu0 %vm2066_vm0, %v2067_v9 }
 0x378   : > { %v1008_v31 = vmul.f32 %v1994_v30, %v1986_v16  ;;  %v1088_v32 = vpop.permute.xlu0 %1087  ;;  %1895 = vmatprep.subr.mxu0 %v2067_v9  ;;  %v1240_v33 = vpop.permute.xlu1 %1239 }
 0x379   : > { %1881 = vmatpush3.msra.mxu1 %v1088_v32 }
 0x37a   : > { %1883 = vmatmul.mubr.msk.f32.vlgmr.msra.gmra.mrb[8].mxu1 %vm661_vm2, %v1008_v31  ;;  %1890 = vmatprep.subr.mxu1 %v2067_v9 }
 0x37b   : > { %v1996_v34 = vpop.eup %1995  ;;  %1891 = vmatpush3.msra.mxu1 %v1240_v33  ;;  %1892 = vmatprep.mubr.msk.f32.mxu1 %vm2066_vm0, %v2067_v9 }
 0x37c   : > { %v1009_v35 = vmul.f32 %v1996_v34, %v1988_v19  ;;  %1900 = vmatprep.subr.mxu1 %v2067_v9 }
 0x37e   : > { %1888 = vmatmul.mubr.msk.f32.vlgmr.msra.gmra.mrb[10].mxu0 %vm661_vm2, %v1009_v35 }
 0x37f   : > { %v1998_v36 = vpop.eup %1997  ;;  %1897 = vmatprep.mubr.msk.f32.mxu0 %vm2066_vm0, %v2067_v9  ;;  %1896 = vmatpush3.msra.mxu0 %v337_v38 }
 0x380   : > { %v1010_v37 = vmul.f32 %v1998_v36, %v1990_v21  ;;  %1905 = vmatprep.subr.mxu0 %v2067_v9 }
 0x382   : > { %1893 = vmatmul.mubr.msk.f32.vlgmr.msra.gmra.mrb[10].mxu1 %vm661_vm2, %v1010_v37 }
 0x383   : > { %1902 = vmatprep.mubr.msk.f32.mxu1 %vm2066_vm0, %v2067_v9  ;;  %1901 = vmatpush3.msra.mxu1 %v338_v39 }
 0x384   : > { %1910 = vmatprep.subr.mxu1 %v2067_v9 }
 0x449   : > { %v1083_v41 = vpop.f32.mrb[8].mxu0 }
 0x44a   : > { %v1879_v42 = vpop.f32.mrb[9].mxu0  ;;  %1898 = vmatmul.mubr.msk.f32.vlgmr.msra.gmra.mrb[12].mxu0 %vm661_vm2, %v1083_v41 }
 0x44b   : > { %1906 = vmatpush3.msra.mxu0 %v339_v40  ;;  %1907 = vmatprep.mubr.msk.f32.mxu0 %vm2066_vm0, %v2067_v9 }
 0x44d   : > { %v1159_v44 = vpop.f32.mrb[8].mxu1 }
 0x44e   : > { %v1884_v45 = vpop.f32.mrb[9].mxu1  ;;  %1903 = vmatmul.mubr.msk.f32.vlgmr.msra.gmra.mrb[12].mxu1 %vm661_vm2, %v1159_v44 }
 0x44f   : > { %1911 = vmatpush3.msra.mxu1 %v340_v43  ;;  %1912 = vmatprep.mubr.msk.f32.mxu1 %vm2066_vm0, %v2067_v9  ;;  %v1760_v9 = vld [vmem:[%s2410_s5] ss:$0 sm:$0xff] }
 0x451   : > { %v1235_v46 = vpop.f32.mrb[10].mxu0 }
 0x452   : > { %v1889_v47 = vpop.f32.mrb[11].mxu0  ;;  %1908 = vmatmul.mubr.msk.f32.vlgmr.msra.gmra.mrb[14].mxu0 %vm661_vm2, %v1235_v46 }
 0x455   : > { %v1311_v48 = vpop.f32.mrb[10].mxu1 }
 0x456   : > { %v1894_v49 = vpop.f32.mrb[11].mxu1  ;;  %1913 = vmatmul.mubr.msk.f32.vlgmr.msra.gmra.mrb[14].mxu1 %vm661_vm2, %v1311_v48 }
 0x51d   : > { %v1384_v50 = vpop.f32.mrb[12].mxu0 }
 0x51e   : > { %v1899_v51 = vpop.f32.mrb[13].mxu0 }
 0x521   : > { %v1457_v52 = vpop.f32.mrb[12].mxu1 }
 0x522   : > { %v1607_v53 = vadd.f32 %v1457_v52, %v1384_v50  ;;  %v1904_v54 = vpop.f32.mrb[13].mxu1 }
 0x525   : > { %v1530_v55 = vpop.f32.mrb[14].mxu0 }
 0x526   : > { %v1608_v56 = vadd.f32 %v1607_v53, %v1530_v55  ;;  %v1909_v57 = vpop.f32.mrb[15].mxu0 }
 0x529   : > { %v1603_v58 = vpop.f32.mrb[14].mxu1 }
 0x52a   : > { %v1609_v59 = vadd.f32 %v1608_v56, %v1603_v58  ;;  %v1914_v60 = vpop.f32.mrb[15].mxu1 }
 0x52c   : > { %v1616_v61 = vadd.f32 %v1760_v9, %v1609_v59 }
 0x52e   : > { %v1617_v62 = vadd.f32 %v1616_v61, %v2212_v18  ;;  %v1761_v18 = vld [vmem:[%s2411_s6] ss:$0 sm:$0xff] }
 0x530   : > { %v1618_v63 = vsel %vm368_vm1, %v1617_v62, 0.0 }
 0x531   : > { %1619 = vadd.xlane.f32.xlu0 %v1618_v63 }
 0x5be   : > { %v1620_v0 = vpop.xlane.xlu0 %1619 }
 0x5bf   : > { %v1622_v1 = vmul.f32 0.03125, %v1620_v0 }
 0x5c1   : > { %v1623_v2 = vsub.f32 %v1617_v62, %v1622_v1 }
 0x5c3   : > { %v1624_v3 = vmul.f32 %v1623_v2, %v1623_v2 }
 0x5c5   : > { %v1625_v4 = vsel %vm368_vm1, %v1624_v3, 0.0 }
 0x5c6   : > { %1626 = vadd.xlane.f32.xlu1 %v1625_v4 }
 0x653   : > { %v1627_v5 = vpop.xlane.xlu1 %1626 }
 0x654   : > { %v1628_v6 = vmul.f32 0.03125, %v1627_v5 }
 0x656   : > { %v1629_v7 = vadd.f32 1e-12, %v1628_v6 }
 0x658   : > { %1999 = vrsqrt.f32 %v1629_v7 }
 0x662   : > { %v2000_v8 = vpop.eup %1999 }
 0x663   : > { %v1631_v10 = vmul.f32 %v2000_v8, %v1623_v2 }
 0x665   : > { %v1638_v12 = vmul.f32 %v1761_v18, %v1631_v10 }
 0x667   : > { %v1645_v13 = vadd.f32 %v1762_v11, %v1638_v12 }
 0x669   : > { %1646 = vst.msk [vmem:[%s307_s21] sm:$0xff] %vm368_vm1, %v1645_v13 }
 0x66a   : > { %2014 = shalt.err (!%p2011_p3)
}
 0x66b   : > { %s2015_s25 = scalar_lea.hbm %s2362_s26, 128  ;;  %s2019_s19 = scalar_lea.hbm %s2413_s8, 256 }
 0x66c   : > { %p2016_p4 = scmp.ne.s32.totalorder %s2362_s26, %s2015_s25  ;;  %p2020_p9 = scmp.lt.u32.totalorder %s2362_s26, %s2413_s8 }
 0x66d   : > { %p2021_p10 = scmp.lt.u32.totalorder %s2019_s19, %s2015_s25  ;;  %p2023_p12 = scmp.lt.u32.totalorder %s2015_s25, %s2362_s26 }
 0x66e   : > { %p2017_p7 = pnand %p2016_p4, %p2154_p5 }
 0x66f   : > { %p2022_p11 = por %p2021_p10, %p2020_p9 }
 0x670   : > { %p2018_p8 = pneg %p2017_p7 }
 0x671   : > { %p2024_p13 = por %p2023_p12, %p2022_p11 }
 0x673   : > { %p2025_p0 = pnand %p2024_p13, %p2018_p8 }
 0x675   : > { %2028 = shalt.err (!%p2025_p0)
}
 0x676   : > { %1939 = dma.vmem_to_hbm [thread:$0]  (%p2154_p5), %s2364_s22, 128, %s2362_s26, %s1648_s10  }
 0x677 PF: > { %p1945_p1 = scmp.ge.s32.totalorder %s2063_s30, 2  ;;  %s1673_s24 = sand.u32 1, %s2051_s27  }
 0x678   : > { %s1674_s20 = scalar_lea.sflag [#allocation3], %s1673_s24 }
 0x679   : > { %p1942_p2 = pnand %p1945_p1, %p2158_p6 }
 0x67b   : > { %2046 = dma.done.wait (!%p1942_p2), %s1674_s20, 128  }
 0x67c   : > { %2048 = vsyncadd (!%p1942_p2), %s1674_s20, 4294967168  ;;  %p18_p3 = scmp.ge.s32.totalorder %s2141_s11, 4   ;;  %s2416_s27 = smov %s2055_s28 }
 0x67d   : > { %s2417_s28 = smov %s2059_s29  ;;  %s2418_s29 = smov %s2152_s14 }
 0x67e   : > { %s2419_s30 = smov %s2141_s11  ;;  %20 = sbr.rel (!%p18_p3) target bundleno = 3 (0x3), region = 90 }
 0x685   :  { %1679 = vsyncpa [#allocation3], 1 }
 0x686   :  { %1681 = vsyncpa [#allocation3 + $0x1], 1 }

</bundles_post_ra>
